<compile_context>
chip_gen: v6e
topology: v6e:2x2x1
jax: 0.10.0
libtpu: 0.0.40
codegen_flags: <defaults>
</compile_context>

<pallas_src>
from functools import partial

import jax
import jax.numpy as jnp
from jax.experimental import pallas as pl
from jax.experimental.pallas import tpu as pltpu


# ----------------------------------------------------------------------------
# Kernels.
#   x_ref  : (B_TILE, C_in, Lp)            padded input slab for this batch tile
#   w_ref  : (C_out_pad, K*C_in)           FULL weight, resident in VMEM
#   b_ref  : (C_out_pad, 1)  f32           FULL bias, resident in VMEM
#   o_ref  : (co_tile, B_TILE*L_out)       lane-dense output tile
#   xi_ref : (K*C_in, B_TILE*L_out)        VMEM scratch: im2col RHS
# ----------------------------------------------------------------------------
def _conv1d_im2col_kernel(x_ref, w_ref, b_ref, o_ref, xi_ref, *, K, co_tile,
                          build_once):
    b_tile, c_in, Lp = x_ref.shape
    L_out = Lp - K + 1
    co = pl.program_id(1)

    def build_rhs():
        # (K*C_in, B_TILE*L_out) im2col slab; small static K/B_TILE -> unrolled.
        for b in range(b_tile):
            xb = x_ref[b]                                   # (C_in, Lp)
            for k in range(K):
                xi_ref[k * c_in:(k + 1) * c_in,
                       b * L_out:(b + 1) * L_out] = xb[:, k:k + L_out]

    if build_once:
        # co is the innermost "arbitrary" axis: co == 0 runs first for every
        # batch tile on each core, so the scratch stays valid for the rest.
        pl.when(co == 0)(build_rhs)
    else:
        # co axis is "parallel" (megacore) -> rebuild the cheap RHS per tile.
        build_rhs()

    start = pl.multiple_of(co * co_tile, co_tile)
    w = w_ref[pl.ds(start, co_tile), :]                     # (co_tile, K*C_in)
    bias = b_ref[pl.ds(start, co_tile), :]                  # (co_tile, 1) f32

    acc = jnp.dot(w, xi_ref[...], preferred_element_type=jnp.float32)
    o_ref[...] = (acc + bias).astype(o_ref.dtype)


def _conv1d_pointwise_kernel(x_ref, w_ref, b_ref, o_ref, *, co_tile):
    # K == 1 and B_TILE == 1: no im2col needed, matmul straight off the input.
    co = pl.program_id(1)
    start = pl.multiple_of(co * co_tile, co_tile)
    w = w_ref[pl.ds(start, co_tile), :]                     # (co_tile, C_in)
    bias = b_ref[pl.ds(start, co_tile), :]                  # (co_tile, 1)
    acc = jnp.dot(w, x_ref[0], preferred_element_type=jnp.float32)
    o_ref[...] = (acc + bias).astype(o_ref.dtype)


# ----------------------------------------------------------------------------
# Tiling heuristics.
# ----------------------------------------------------------------------------
def _co_tile_target():
    """MXU-native C_out tile: 128 on v5-class chips, 256 on v6e/v7x."""
    try:
        kind = jax.devices()[0].device_kind.lower()
    except Exception:
        kind = ""
    return 128 if "v5" in kind else 256


def _pick_co_tile(c_out, target):
    if c_out <= target:
        return c_out                    # single tile == full dim (always legal)
    n_tiles = -(-c_out // target)       # ceil
    tile = -(-c_out // n_tiles)         # minimal even split
    return -(-tile // 8) * 8            # sublane-aligned


def _pick_b_tile(n, l_out, lane_target):
    """Largest divisor of N packing the lane dim up to ~lane_target columns."""
    if l_out >= lane_target:
        return 1
    best = 1
    for cand in range(1, n + 1):
        if n % cand == 0 and cand * l_out <= lane_target:
            best = cand
    return best


def _vmem_cap_bytes():
    try:
        phys = int(getattr(pltpu.get_tpu_info(), "vmem_capacity_bytes"))
    except Exception:
        phys = 64 * 1024 * 1024
    return (phys * 3) // 4              # headroom for compiler internal scratch


# ----------------------------------------------------------------------------
# Wrapper: PyTorch-style Conv1d (stride 1, padding=K//2) + bias, NCL layout.
# ----------------------------------------------------------------------------
def conv1d_pallas(x, w, b=None, *, compute_dtype=jnp.bfloat16, co_tile=None,
                  b_tile=None, lane_target=512, interpret=False):
    N, c_in, L = x.shape
    c_out, c_in_w, K = w.shape
    assert c_in == c_in_w, (c_in, c_in_w)
    pad = K // 2
    Lp = L + 2 * pad
    L_out = Lp - K + 1                  # == L for odd K (matches PyTorch)

    out_dtype = x.dtype
    cdt = jnp.dtype(compute_dtype) if compute_dtype is not None else jnp.dtype(x.dtype)
    itemsize = cdt.itemsize
    out_itemsize = jnp.dtype(out_dtype).itemsize

    # ---- batch-lane packing -------------------------------------------------
    if b_tile is None:
        b_tile = _pick_b_tile(N, L_out, lane_target)
    assert N % b_tile == 0, (N, b_tile)
    n_nb = N // b_tile
    lanes = b_tile * L_out

    # ---- C_out tiling (pad weight/bias with zeros if needed) ----------------
    if co_tile is None:
        co_tile = _pick_co_tile(c_out, _co_tile_target())
    co_tile = min(co_tile, c_out)
    n_co = -(-c_out // co_tile)
    co_pad = n_co * co_tile

    # ---- operand prep --------------------------------------------------------
    xp = jnp.pad(x.astype(cdt), ((0, 0), (0, 0), (pad, pad)))       # (N,Ci,Lp)
    x4 = xp.reshape(n_nb, b_tile, c_in, Lp)

    # (C_out, C_in, K) -> (C_out_pad, K*C_in), C_in minor (K never hits lanes).
    w2 = jnp.transpose(w, (0, 2, 1)).reshape(c_out, K * c_in).astype(cdt)
    if b is None:
        b = jnp.zeros((c_out,), jnp.float32)
    b2 = b.astype(jnp.float32).reshape(c_out, 1)
    if co_pad != c_out:
        w2 = jnp.pad(w2, ((0, co_pad - c_out), (0, 0)))
        b2 = jnp.pad(b2, ((0, co_pad - c_out), (0, 0)))

    # ---- kernel / semantics selection ---------------------------------------
    direct = (K == 1 and b_tile == 1)
    build_once = not (n_nb == 1 and n_co > 1)
    if build_once:
        dims = ("parallel", "arbitrary")    # batch tiles across cores
    else:
        dims = ("arbitrary", "parallel")    # single batch tile: split C_out

    if direct:
        kernel = partial(_conv1d_pointwise_kernel, co_tile=co_tile)
        scratch = []
    else:
        kernel = partial(_conv1d_im2col_kernel, K=K, co_tile=co_tile,
                         build_once=build_once)
        scratch = [pltpu.VMEM((K * c_in, lanes), cdt)]

    # ---- VMEM budget (resident weight/bias + double-buffered blocks) --------
    lanes_pad = max(lanes, 128)
    est = (co_pad * K * c_in * itemsize                    # resident weight
           + co_pad * 128 * 4                              # resident bias
           + 2 * b_tile * c_in * Lp * itemsize             # x block (dbl-buf)
           + 2 * co_tile * lanes_pad * out_itemsize        # out block (dbl-buf)
           + (0 if direct else K * c_in * lanes_pad * itemsize))
    cap = _vmem_cap_bytes()
    vmem_limit = int(min(max(2 * est, 16 * 1024 * 1024), cap))

    cost = pl.CostEstimate(
        flops=int(2 * N * c_out * K * c_in * L_out),
        transcendentals=0,
        bytes_accessed=int(x4.size * itemsize + w2.size * itemsize
                           + b2.size * 4 + n_nb * co_pad * lanes * out_itemsize),
    )

    out = pl.pallas_call(
        kernel,
        out_shape=jax.ShapeDtypeStruct((n_nb, co_pad, lanes), out_dtype),
        grid_spec=pltpu.PrefetchScalarGridSpec(
            num_scalar_prefetch=0,
            grid=(n_nb, n_co),
            in_specs=[
                # Full padded slab for this batch tile; index does not depend
                # on `co`, so it stays resident across all C_out tiles.
                pl.BlockSpec((None, b_tile, c_in, Lp), lambda nb, co: (nb, 0, 0, 0)),
                # Full weight / bias, constant index map -> DMA'd exactly once.
                pl.BlockSpec((co_pad, K * c_in), lambda nb, co: (0, 0)),
                pl.BlockSpec((co_pad, 1), lambda nb, co: (0, 0)),
            ],
            out_specs=pl.BlockSpec((None, co_tile, lanes),
                                   lambda nb, co: (nb, co, 0)),
            scratch_shapes=scratch,
        ),
        compiler_params=pltpu.CompilerParams(
            dimension_semantics=dims,
            vmem_limit_bytes=vmem_limit,
            allow_input_fusion=[True, False, False],
        ),
        cost_estimate=cost,
        interpret=interpret,
    )(x4, w2, b2)

    # (n_nb, co_pad, B_TILE*L_out) -> (N, C_out, L_out)
    y = out.reshape(n_nb, co_pad, b_tile, L_out).transpose(0, 2, 1, 3)
    y = y.reshape(N, co_pad, L_out)
    return y[:, :c_out, :] if co_pad != c_out else y


# ----------------------------------------------------------------------------
# Deterministic parameter init mirroring weight_init() from the module.
# ----------------------------------------------------------------------------
def weight_init(key, shape, mode, fan_in, fan_out):
    if mode == "xavier_uniform":
        return jnp.sqrt(6.0 / (fan_in + fan_out)) * (
            jax.random.uniform(key, shape, jnp.float32) * 2.0 - 1.0)
    if mode == "xavier_normal":
        return jnp.sqrt(2.0 / (fan_in + fan_out)) * jax.random.normal(key, shape, jnp.float32)
    if mode == "kaiming_uniform":
        return jnp.sqrt(3.0 / fan_in) * (
            jax.random.uniform(key, shape, jnp.float32) * 2.0 - 1.0)
    if mode == "kaiming_normal":
        return jnp.sqrt(1.0 / fan_in) * jax.random.normal(key, shape, jnp.float32)
    raise ValueError(f'Invalid init mode "{mode}"')


class Conv1d:
    """JAX/Pallas port of the PyTorch Conv1d wrapper (non-resampling path)."""

    def __init__(self, in_dim, out_dim, kernel=3, bias=True, up=False, down=False,
                 resample_filter=(1, 1), fused_resample=False,
                 init_mode="kaiming_normal", init_weight=1.0, init_bias=0.0,
                 compute_dtype=jnp.bfloat16, *, key):
        assert not (up and down)
        self.in_dim, self.out_dim = in_dim, out_dim
        self.kernel = kernel
        self.compute_dtype = compute_dtype
        # TODO(synk): up/down/fused_resample branches (conv_transpose1d / strided
        # depthwise resample-filter convs) are not ported in this kernel.
        if up or down or fused_resample:
            raise NotImplementedError("resampling branches not ported")

        fan_in, fan_out = in_dim * kernel, out_dim * kernel
        kw, kb = jax.random.split(key)
        self.weight = (
            weight_init(kw, (out_dim, in_dim, kernel), init_mode, fan_in, fan_out)
            * init_weight if kernel else None)
        self.bias = (
            weight_init(kb, (out_dim,), init_mode, fan_in, fan_out) * init_bias
            if (kernel and bias) else None)

    def __call__(self, x):
        if self.weight is None:        # kernel == 0: no conv, no bias applied
            return x
        return conv1d_pallas(x, self.weight, self.bias,
                             compute_dtype=self.compute_dtype)


# ----------------------------------------------------------------------------
# Pure-JAX reference (inputs cast like the kernel's compute dtype, f32 math).
# ----------------------------------------------------------------------------
def conv1d_ref(x, w, b, compute_dtype=jnp.bfloat16):
    xd = x.astype(compute_dtype).astype(jnp.float32)
    wd = w.astype(compute_dtype).astype(jnp.float32)
    N, c_in, L = xd.shape
    c_out, _, K = wd.shape
    pad = K // 2
    L_out = L + 2 * pad - K + 1
    xp = jnp.pad(xd, ((0, 0), (0, 0), (pad, pad)))
    windows = jnp.stack([xp[:, :, k:k + L_out] for k in range(K)], axis=-1)  # (N,Ci,Lo,K)
    out = jnp.einsum("oik,nilk->nol", wd, windows,
                     preferred_element_type=jnp.float32)
    return out + b.astype(jnp.float32)[None, :, None]


if __name__ == "__main__":
    key = jax.random.PRNGKey(0)
    k_mod, k_x, k_mod2, k_x2, k_x3, k_w3, k_b3, k_x4, k_w4, k_b4 = jax.random.split(key, 10)
    TOL = dict(atol=1e-2, rtol=1e-2)

    # Test 1: K=3 "same" conv with bias (default module path, batch-lane packed).
    N, C_IN, C_OUT, L, K = 2, 8, 16, 32, 3
    mod = Conv1d(C_IN, C_OUT, kernel=K, bias=True, init_bias=0.5, key=k_mod)
    x = jax.random.normal(k_x, (N, C_IN, L), jnp.float32)
    out = jax.block_until_ready(mod(x))
    ref = conv1d_ref(x, mod.weight, mod.bias)
    assert out.shape == (N, C_OUT, L), out.shape
    assert jnp.allclose(out, ref, **TOL), float(jnp.max(jnp.abs(out - ref)))

    # Test 2: K=1 pointwise conv, no bias, direct (no-scratch) path via b_tile=1.
    mod1 = Conv1d(C_IN, C_OUT, kernel=1, bias=False, key=k_mod2)
    x1 = jax.random.normal(k_x2, (N, C_IN, L), jnp.float32)
    out1 = jax.block_until_ready(
        conv1d_pallas(x1, mod1.weight, None, b_tile=1))
    ref1 = conv1d_ref(x1, mod1.weight, jnp.zeros((C_OUT,), jnp.float32))
    assert jnp.allclose(out1, ref1, **TOL), float(jnp.max(jnp.abs(out1 - ref1)))

    # Test 3: multiple C_out tiles with a single batch-tile (exercises the
    # resident-weight in-kernel slicing + per-tile RHS rebuild / parallel-co).
    N3, CI3, CO3, L3 = 2, 16, 32, 64
    w3 = jax.random.normal(k_w3, (CO3, CI3, 3), jnp.float32) * 0.1
    b3 = jax.random.normal(k_b3, (CO3,), jnp.float32)
    x3 = jax.random.normal(k_x3, (N3, CI3, L3), jnp.float32)
    out3 = jax.block_until_ready(conv1d_pallas(x3, w3, b3, co_tile=16))
    ref3 = conv1d_ref(x3, w3, b3)
    assert jnp.allclose(out3, ref3, **TOL), float(jnp.max(jnp.abs(out3 - ref3)))

    # Test 4: C_out not divisible by the tile (zero-padded weight, sliced off).
    N4, CI4, CO4, L4 = 2, 4, 20, 16
    w4 = jax.random.normal(k_w4, (CO4, CI4, 3), jnp.float32) * 0.1
    b4 = jax.random.normal(k_b4, (CO4,), jnp.float32)
    x4 = jax.random.normal(k_x4, (N4, CI4, L4), jnp.float32)
    out4 = jax.block_until_ready(conv1d_pallas(x4, w4, b4, co_tile=8))
    ref4 = conv1d_ref(x4, w4, b4)
    assert out4.shape == (N4, CO4, L4), out4.shape
    assert jnp.allclose(out4, ref4, **TOL), float(jnp.max(jnp.abs(out4 - ref4)))

    print("KERNEL_OK")
</pallas_src>

<mosaic_0001>
module attributes {stable_mosaic.version = 11 : i64} {
  func.func @_conv1d_im2col_kernel(%arg0: i32, %arg1: i32, %arg2: memref<1x2x8x34xbf16, #tpu.memory_space<vmem>>, %arg3: memref<16x24xbf16, #tpu.memory_space<vmem>>, %arg4: memref<16x1xf32, #tpu.memory_space<vmem>>, %arg5: memref<1x16x64xf32, #tpu.memory_space<vmem>>, %arg6: memref<24x64xbf16, #tpu.memory_space<vmem>>) attributes {dimension_semantics = [#tpu.dimension_semantics<parallel>, #tpu.dimension_semantics<arbitrary>], iteration_bounds = array<i64: 1, 1>, scalar_prefetch = 0 : i64, scratch_operands = 1 : i64, tpu.core_type = #tpu.core_type<tc>, window_params = [{transform_indices = @transform_0, window_bounds = array<i64: 1, 2, 8, 34>}, {pipeline_mode = #tpu.pipeline_mode<synchronous>, transform_indices = @transform_1, window_bounds = array<i64: 16, 24>}, {pipeline_mode = #tpu.pipeline_mode<synchronous>, transform_indices = @transform_2, window_bounds = array<i64: 16, 1>}, {transform_indices = @transform_3, window_bounds = array<i64: 1, 16, 64>}]} {
    %c0_i32 = arith.constant 0 : i32
    %0 = arith.cmpi eq, %arg1, %c0_i32 : i32
    %1 = arith.extui %0 : i1 to i32
    %c0_i32_0 = arith.constant 0 : i32
    %2 = arith.cmpi ne, %1, %c0_i32_0 : i32
    scf.if %2 {
      %c0_7 = arith.constant 0 : index
      %c0_8 = arith.constant 0 : index
      %c0_9 = arith.constant 0 : index
      %c0_10 = arith.constant 0 : index
      %16 = vector.load %arg2[%c0_7, %c0_8, %c0_9, %c0_10] : memref<1x2x8x34xbf16, #tpu.memory_space<vmem>>, vector<1x1x8x34xbf16>
      %17 = vector.shape_cast %16 : vector<1x1x8x34xbf16> to vector<8x34xbf16>
      %18 = vector.extract_strided_slice %17 {offsets = [0, 0], sizes = [8, 32], strides = [1, 1]} : vector<8x34xbf16> to vector<8x32xbf16>
      %c0_11 = arith.constant 0 : index
      %c0_12 = arith.constant 0 : index
      %19 = vector.load %arg6[%c0_11, %c0_12] : memref<24x64xbf16, #tpu.memory_space<vmem>>, vector<8x32xbf16>
      tpu.vector_store %arg6[%c0_11, %c0_12], %18 {strides = array<i32>} : memref<24x64xbf16, #tpu.memory_space<vmem>>, vector<8x32xbf16>,
      %20 = vector.extract_strided_slice %17 {offsets = [0, 1], sizes = [8, 32], strides = [1, 1]} : vector<8x34xbf16> to vector<8x32xbf16>
      %c8 = arith.constant 8 : index
      %c0_13 = arith.constant 0 : index
      %21 = vector.load %arg6[%c8, %c0_13] : memref<24x64xbf16, #tpu.memory_space<vmem>>, vector<8x32xbf16>
      tpu.vector_store %arg6[%c8, %c0_13], %20 {strides = array<i32>} : memref<24x64xbf16, #tpu.memory_space<vmem>>, vector<8x32xbf16>,
      %22 = vector.extract_strided_slice %17 {offsets = [0, 2], sizes = [8, 32], strides = [1, 1]} : vector<8x34xbf16> to vector<8x32xbf16>
      %c16 = arith.constant 16 : index
      %c0_14 = arith.constant 0 : index
      %23 = vector.load %arg6[%c16, %c0_14] : memref<24x64xbf16, #tpu.memory_space<vmem>>, vector<8x32xbf16>
      tpu.vector_store %arg6[%c16, %c0_14], %22 {strides = array<i32>} : memref<24x64xbf16, #tpu.memory_space<vmem>>, vector<8x32xbf16>,
      %c0_15 = arith.constant 0 : index
      %c1 = arith.constant 1 : index
      %c0_16 = arith.constant 0 : index
      %c0_17 = arith.constant 0 : index
      %24 = vector.load %arg2[%c0_15, %c1, %c0_16, %c0_17] : memref<1x2x8x34xbf16, #tpu.memory_space<vmem>>, vector<1x1x8x34xbf16>
      %25 = vector.shape_cast %24 : vector<1x1x8x34xbf16> to vector<8x34xbf16>
      %26 = vector.extract_strided_slice %25 {offsets = [0, 0], sizes = [8, 32], strides = [1, 1]} : vector<8x34xbf16> to vector<8x32xbf16>
      %c0_18 = arith.constant 0 : index
      %c32 = arith.constant 32 : index
      %27 = vector.load %arg6[%c0_18, %c32] : memref<24x64xbf16, #tpu.memory_space<vmem>>, vector<8x32xbf16>
      tpu.vector_store %arg6[%c0_18, %c32], %26 {strides = array<i32>} : memref<24x64xbf16, #tpu.memory_space<vmem>>, vector<8x32xbf16>,
      %28 = vector.extract_strided_slice %25 {offsets = [0, 1], sizes = [8, 32], strides = [1, 1]} : vector<8x34xbf16> to vector<8x32xbf16>
      %c8_19 = arith.constant 8 : index
      %c32_20 = arith.constant 32 : index
      %29 = vector.load %arg6[%c8_19, %c32_20] : memref<24x64xbf16, #tpu.memory_space<vmem>>, vector<8x32xbf16>
      tpu.vector_store %arg6[%c8_19, %c32_20], %28 {strides = array<i32>} : memref<24x64xbf16, #tpu.memory_space<vmem>>, vector<8x32xbf16>,
      %30 = vector.extract_strided_slice %25 {offsets = [0, 2], sizes = [8, 32], strides = [1, 1]} : vector<8x34xbf16> to vector<8x32xbf16>
      %c16_21 = arith.constant 16 : index
      %c32_22 = arith.constant 32 : index
      %31 = vector.load %arg6[%c16_21, %c32_22] : memref<24x64xbf16, #tpu.memory_space<vmem>>, vector<8x32xbf16>
      tpu.vector_store %arg6[%c16_21, %c32_22], %30 {strides = array<i32>} : memref<24x64xbf16, #tpu.memory_space<vmem>>, vector<8x32xbf16>,
    } else {
    }
    %c16_i32 = arith.constant 16 : i32
    %3 = arith.muli %arg1, %c16_i32 : i32
    %4 = tpu.assume_multiple %3, 16 : i32
    %5 = arith.index_cast %4 : i32 to index
    %c0 = arith.constant 0 : index
    %6 = vector.load %arg3[%5, %c0] : memref<16x24xbf16, #tpu.memory_space<vmem>>, vector<16x24xbf16>
    %7 = arith.index_cast %4 : i32 to index
    %c0_1 = arith.constant 0 : index
    %8 = vector.load %arg4[%7, %c0_1] : memref<16x1xf32, #tpu.memory_space<vmem>>, vector<16x1xf32>
    %c0_2 = arith.constant 0 : index
    %c0_3 = arith.constant 0 : index
    %9 = vector.load %arg6[%c0_2, %c0_3] : memref<24x64xbf16, #tpu.memory_space<vmem>>, vector<24x64xbf16>
    %cst = arith.constant dense<0.000000e+00> : vector<16x64xf32>
    %10 = tpu.matmul %6, %9, %cst {dimension_numbers = #tpu.dot_dimension_numbers<[1], [0], [0], [1], [0, 0, 1, 1], [], []>} : vector<16x24xbf16>, vector<24x64xbf16>, vector<16x64xf32> -> vector<16x64xf32>
    %11 = vector.broadcast %8 : vector<16x1xf32> to vector<16x64xf32>
    %12 = arith.addf %10, %11 : vector<16x64xf32>
    %c0_4 = arith.constant 0 : index
    %c0_5 = arith.constant 0 : index
    %c0_6 = arith.constant 0 : index
    %13 = vector.load %arg5[%c0_4, %c0_5, %c0_6] : memref<1x16x64xf32, #tpu.memory_space<vmem>>, vector<1x16x64xf32>
    %14 = vector.shape_cast %13 : vector<1x16x64xf32> to vector<16x64xf32>
    %15 = vector.shape_cast %12 : vector<16x64xf32> to vector<1x16x64xf32>
    tpu.vector_store %arg5[%c0_4, %c0_5, %c0_6], %15 {strides = array<i32>} : memref<1x16x64xf32, #tpu.memory_space<vmem>>, vector<1x16x64xf32>,
    return
  }
  func.func @transform_0(%arg0: i32, %arg1: i32) -> (i32, i32, i32, i32) {
    %c0_i32 = arith.constant 0 : i32
    %c0_i32_0 = arith.constant 0 : i32
    %c0_i32_1 = arith.constant 0 : i32
    %c0_i32_2 = arith.constant 0 : i32
    return %arg0, %c0_i32, %c0_i32_0, %c0_i32_1 : i32, i32, i32, i32
  }
  func.func @transform_1(%arg0: i32, %arg1: i32) -> (i32, i32) {
    %c0_i32 = arith.constant 0 : i32
    %c0_i32_0 = arith.constant 0 : i32
    %c0_i32_1 = arith.constant 0 : i32
    return %c0_i32, %c0_i32_0 : i32, i32
  }
  func.func @transform_2(%arg0: i32, %arg1: i32) -> (i32, i32) {
    %c0_i32 = arith.constant 0 : i32
    %c0_i32_0 = arith.constant 0 : i32
    %c0_i32_1 = arith.constant 0 : i32
    return %c0_i32, %c0_i32_0 : i32, i32
  }
  func.func @transform_3(%arg0: i32, %arg1: i32) -> (i32, i32, i32) {
    %c0_i32 = arith.constant 0 : i32
    %c0_i32_0 = arith.constant 0 : i32
    return %arg0, %arg1, %c0_i32 : i32, i32, i32
  }
}

</mosaic_0001>

<bundles_post_ra>
// kernel: tpu_custom_call.1
= control target key start
LH: loop header
LB: loop body
LE: loop exit
PB: predicated region body
PF: predicated region fallthrough
CT: control target
= control target key end

     0   :  { %s209_s14 = smov 126   ;;  %vm21_vm0 = vcmask 257024   ;;  %s210_s17 = smov 127   ;;  %v211_v2 = vmov 0.0   ;;  %s261_s0 = inlined_call_operand.vmem [shape: bf16[1,2,8,34], index: 0, kind: input, shape index: {}]   ;;  %s262_s1 = inlined_call_operand.vmem [shape: bf16[16,24], index: 1, kind: input, shape index: {}]   ;;  %s263_s2 = inlined_call_operand.vmem [shape: f32[16,1], index: 2, kind: input, shape index: {}]   ;;  %s264_s3 = inlined_call_operand.hbm [shape: f32[1,16,64], index: 3, kind: output, shape index: {}]  }
   0x1   :  { %v20_v0 = vld [vmem:[%s261_s0] sm:$0xf]  ;;  %v155_v1 = vld [vmem:[%s261_s0 + $0x4] sm:$0xf]  ;;  %163 = vmatprep.subr.bf16.mxu0 %v211_v2 }
   0x2   :  { %28 = vrot.lane.b32.xlu0 %v20_v0, %s209_s14  ;;  %24 = vrot.lane.b32.xlu1 %v20_v0, %s210_s17  ;;  %22 = vst.msk [vmem:[#allocation2] sm:$0xf] %vm21_vm0, %v20_v0 }
   0x3   :  { %8 = vsyncpa [#allocation4], 0  ;;  %s212_s18 = smov 30   ;;  %s213_s19 = smov 32   ;;  %vm214_vm1 = vmmov 0   ;;  %v56_v3 = vld [vmem:[%s263_s2] sm:$0xff] }
   0x4   :  { %167 = vmatprep.mubr.msk.bf16.mxu0 %vm214_vm1, %v211_v2  ;;  %s215_s20 = smov 31   ;;  %v216_v4 = vmov 0   ;;  %v57_v5 = vld [vmem:[%s263_s2 + $0x8] sm:$0xff]  ;;  %vm38_vm2 = vcmask 519424   ;;  %vm89_vm3 = vcmask 1043456   ;;  %v186_v14 = vld [vmem:[%s262_s1] sm:$0xff]  }
   0x5   :  { %182 = vset.pattern.permute.xlu1 %v216_v4  ;;  %183 = vset.pattern.permute.xlu0 %v216_v4  ;;  %vm85_vm4 = vcmask 195584   ;;  %vm134_vm5 = vcmask 523264   ;;  %s217_s25 = smov [#allocation3]  }
   0x6   :  { %44 = vrot.lane.b32.xlu0 %v155_v1, %s212_s18  ;;  %35 = vrot.lane.b32.xlu1 %v155_v1, %s213_s19  ;;  %s142_s26 = sshll.u32 %s217_s25, 4  ;;  %s143_s26 = int_to_ptr.vmem [resolvable:$true] %s142_s26 }
   0x7   :  { %s187_s27 = scalar_lea.vmem %s143_s26, 256  ;;  %p192_p1 = scmp.lt.s32.totalorder %s143_s26, %s143_s26 }
   0x8   :  { %p188_p0 = scmp.ne.s32.totalorder %s143_s26, %s187_s27  ;;  %p193_p2 = scmp.lt.s32.totalorder %s187_s27, %s187_s27 }
   0xa   :  { %40 = vrot.lane.b32.xlu0 %v155_v1, %s215_s20  ;;  %63 = vperm.xlu1 %182, %v56_v3   ;;  %p194_p3 = por %p193_p2, %p192_p1 }
   0xc   :  { %p195_p4 = pnand %p194_p3, %p188_p0 }
   0xe   :  { %68 = vperm.xlu0 %183, %v57_v5  }
  0x74   :  { %v29_v6 = vpop.permute.xlu0 %28  ;;  %v25_v7 = vpop.permute.xlu1 %24 }
  0x75   :  { %31 = vst.msk [vmem:[#allocation2 + $0x8] sm:$0xf] %vm21_vm0, %v29_v6  ;;  %27 = vst.msk [vmem:[#allocation2 + $0x4] sm:$0xf] %vm21_vm0, %v25_v7 }
  0x78   :  { %v45_v8 = vpop.permute.xlu0 %44  ;;  %v36_v9 = vpop.permute.xlu1 %35 }
  0x79   :  { %47 = vst.msk [vmem:[#allocation2 + $0x8] sm:$0xf] %vm38_vm2, %v45_v8  ;;  %39 = vst.msk [vmem:[#allocation2] sm:$0xf] %vm38_vm2, %v36_v9 }
  0x7c   :  { %v41_v10 = vpop.permute.xlu0 %40 }
  0x7d   :  { %43 = vst.msk [vmem:[#allocation2 + $0x4] sm:$0xf] %vm38_vm2, %v41_v10 }
  0x80   :  { %v184_v11 = vld [vmem:[#allocation2 + $0x8] ss:$0 sps:$4 sm:$0xff]  }
  0x81   :  { %v91_v12 = vsel %vm89_vm3, %v184_v11, 0 }
  0x82   :  { %164 = vmatpush3.bf16.msra.mxu0 %v91_v12 }
  0x83   :  { %165 = vmatprep.subr.bf16.mxu0 %v211_v2 }
  0x84   :  { %v185_v13 = vld [vmem:[#allocation2] sm:$0xff]  }
  0x85   :  { %v64_v15 = vpop.permute.xlu1 %63 }
  0x86   :  { %166 = vmatpush3.bf16.msra.mxu0 %v185_v13 }
  0x89   :  { %168 = vmatmul.mubr.msk.bf16.vlgmr.msra.gmra.mxu0 %vm85_vm4, %v186_v14  ;;  %v69_v19 = vpop.permute.xlu0 %68 }
 0x149   :  { %v127_v16 = vpop.f32.mrf.mxu0 }
 0x14a   :  { %v128_v17 = vadd.f32 %v127_v16, %v64_v15 }
 0x14b   :  { %v169_v18 = vpop.f32.mrf.mxu0 }
 0x14c   :  { %135 = vst.msk [vmem:[#allocation3] sm:$0xff] %vm134_vm5, %v128_v17 }
 0x14d   :  { %v130_v20 = vpop.f32.mrf.mxu0 }
 0x14e   :  { %v131_v21 = vadd.f32 %v130_v20, %v69_v19 }
 0x14f   :  { %v170_v22 = vpop.f32.mrf.mxu0 }
 0x150   :  { %136 = vst.msk [vmem:[#allocation3 + $0x8] sm:$0xff] %vm134_vm5, %v131_v21 }
 0x151   :  { %198 = shalt.err (!%p195_p4)
}
 0x152   :  { %s218_s1 = smov 128   ;;  %s219_s28 = smov 8  }
 0x153   :  { %148 = dma.vmem_to_hbm [thread:$0]  %s143_s26, 256, %s264_s3, [#allocation4], %s218_s1, %s218_s1, %s219_s28  }
 0x154   :  { %207 = dma.done.wait [#allocation4], 256  }
 0x155   :  { %208 = vsyncadd [#allocation4], 4294967040 }
 0x156   :  { %152 = vsyncpa [#allocation4], 1 }

</bundles_post_ra>
